<compile_context>
chip_gen: v7x
topology: tpu7x:2x2x1
jax: 0.10.0
libtpu: 0.0.40
codegen_flags: <defaults>
</compile_context>

<pallas_src>
import functools
import math

import jax
import jax.numpy as jnp
from jax.experimental import pallas as pl
from jax.experimental.pallas import tpu as pltpu

_MIB = 1024 * 1024


def _ceil_div(a: int, b: int) -> int:
    return -(-a // b)


def _query_vmem_bytes() -> int:
    """Per-generation VMEM capacity (v5e/v6e: 128 MiB, v7x: 64 MiB per TC)."""
    try:
        info = pltpu.get_tpu_info()
        for attr in ("vmem_capacity_bytes", "vmem_size_bytes", "vmem_bytes"):
            v = getattr(info, attr, None)
            if v:
                return int(min(max(int(v), 32 * _MIB), 512 * _MIB))
    except Exception:
        pass
    return 64 * _MIB  # conservative default (v7x physical VMEM)


def _sublane_multiple(dtype) -> int:
    """Sublane packing multiple: 8 for 32-bit, 16 for bf16, 32 for int8/fp8."""
    itemsize = jnp.dtype(dtype).itemsize
    return max(8, 32 // max(itemsize, 1))


# ---------------------------------------------------------------------------
# Kernels
# ---------------------------------------------------------------------------

def _softmax_lastdim_kernel(x_ref, o_ref):
    # x_ref / o_ref: (TR, L) tile; reduction axis L fully resident in VMEM.
    x = x_ref[...].astype(jnp.float32)
    m = jnp.max(x, axis=-1, keepdims=True)        # XLU cross-lane reduce
    e = jnp.exp(x - m)                            # EUP
    s = jnp.sum(e, axis=-1, keepdims=True)        # XLU
    inv = pl.reciprocal(s, approx=True)           # EUP reciprocal
    inv = inv * (2.0 - s * inv)                   # one Newton step -> ~f32 exact
    o_ref[...] = (e * inv).astype(o_ref.dtype)


def _softmax_middim_kernel(x_ref, o_ref):
    # x_ref / o_ref: (1, S, TL) tile; reduction axis S (sublanes) fully resident,
    # last axis TL lane-dense.  No HBM transpose needed for dim != -1.
    x = x_ref[...].astype(jnp.float32)
    m = jnp.max(x, axis=1, keepdims=True)         # XLU sublane reduce
    e = jnp.exp(x - m)                            # EUP
    s = jnp.sum(e, axis=1, keepdims=True)         # XLU
    inv = pl.reciprocal(s, approx=True)
    inv = inv * (2.0 - s * inv)
    o_ref[...] = (e * inv).astype(o_ref.dtype)


# ---------------------------------------------------------------------------
# Fallback (lane-sparse / oversized reduction axis)
# ---------------------------------------------------------------------------

def _softmax_xla(x, dim):
    # XLA reduces over any axis without a transpose, so this fallback does not
    # reintroduce the moveaxis HBM round-trip.
    xf = x.astype(jnp.float32)
    m = jnp.max(xf, axis=dim, keepdims=True)
    e = jnp.exp(xf - m)
    return (e / jnp.sum(e, axis=dim, keepdims=True)).astype(x.dtype)


# ---------------------------------------------------------------------------
# Tile pickers (byte-based, sublane-aligned, multi-step grids)
# ---------------------------------------------------------------------------

# Per-element VMEM footprint model: 2x input + 2x output double-buffers
# (4 * itemsize) plus ~3 f32 temporaries materialized inside the kernel.
def _bytes_per_elem(itemsize: int) -> int:
    return 4 * itemsize + 3 * 4


def _pick_row_tile(R: int, L: int, itemsize: int, sub: int, vmem_bytes: int) -> int:
    """Largest sublane-aligned row tile under the byte target / VMEM budget,
    while keeping >= ~8 grid steps so megacore sharding + pipelining work."""
    if R <= sub:
        return R
    bytes_per_row = L * _bytes_per_elem(itemsize)
    budget = (vmem_bytes * 3) // 8
    tr_fit = budget // max(bytes_per_row, 1)
    # ~8 MiB input block target: big enough to sit on the HBM roofline on all
    # generations (incl. v7x at 3.2 TB/s); the budget clamp keeps it legal.
    tr_target = (8 * _MIB) // max(L * itemsize, 1)
    # >= 8 grid steps when R allows it (2 TCs on v7x + pipeline depth).
    tr_split = _ceil_div(R, 8)
    tr = min(tr_fit, tr_target, tr_split)
    tr = max(sub, (tr // sub) * sub)
    return min(tr, R)


def _pick_lane_tile(B: int, S: int, T: int, itemsize: int, vmem_bytes: int) -> int:
    """Lane tile (multiple of 128) for the middle-dim path; S stays fully
    resident in every block so no padded element enters the reduction."""
    if T <= 128:
        return T
    bytes_per_lane = S * _bytes_per_elem(itemsize)
    budget = (vmem_bytes * 3) // 8
    tl_fit = budget // max(bytes_per_lane, 1)
    tl_target = (8 * _MIB) // max(S * itemsize, 1)
    steps_over_t = max(_ceil_div(8, max(B, 1)), 1)   # >= ~8 total grid steps
    tl_split = _ceil_div(T, steps_over_t)
    tl = min(tl_fit, tl_target, tl_split, T)
    tl = max(128, (tl // 128) * 128)
    return min(tl, T)


def _vmem_limit(block_elems: int, itemsize: int, vmem_bytes: int) -> int:
    footprint = block_elems * _bytes_per_elem(itemsize)
    needed = (footprint * 3) // 2 + 2 * _MIB         # +50% margin + headroom
    return int(max(min(needed, vmem_bytes - 8 * _MIB), 4 * _MIB))


# ---------------------------------------------------------------------------
# Public wrapper
# ---------------------------------------------------------------------------

@functools.partial(jax.jit, static_argnames=("dim",))
def pallas_softmax(x: jax.Array, dim: int = -1) -> jax.Array:
    orig_shape = x.shape
    ndim = x.ndim
    dim = dim % ndim

    vmem_bytes = _query_vmem_bytes()                 # trace-time query
    itemsize = jnp.dtype(x.dtype).itemsize
    sub = _sublane_multiple(x.dtype)
    budget = (vmem_bytes * 3) // 8

    # ---------------- Path A: softmax over the last (lane) axis -------------
    if dim == ndim - 1:
        L = orig_shape[-1]
        if L < 128:
            # Lane-sparse softmax axis: a Pallas tile would waste most of the
            # 128 lanes and emit masked partial stores; XLA is the better tool.
            return _softmax_xla(x, dim)
        R = math.prod(orig_shape[:-1]) if ndim > 1 else 1
        if sub * L * _bytes_per_elem(itemsize) > budget:
            # TODO(synk): chunked-L online-softmax (second "arbitrary" grid
            # axis over L with running max/sum scratch + pl.when finalize) for
            # rows too long to keep fully resident, esp. on v7x's 64 MiB VMEM.
            return _softmax_xla(x, dim)

        x2d = x.reshape(R, L)                        # pure reshape, no transpose
        TR = _pick_row_tile(R, L, itemsize, sub, vmem_bytes)
        limit = _vmem_limit(TR * L, itemsize, vmem_bytes)

        out2d = pl.pallas_call(
            _softmax_lastdim_kernel,
            out_shape=jax.ShapeDtypeStruct((R, L), x.dtype),
            grid=(pl.cdiv(R, TR),),
            in_specs=[pl.BlockSpec((TR, L), lambda i: (i, 0))],
            out_specs=pl.BlockSpec((TR, L), lambda i: (i, 0)),
            compiler_params=pltpu.CompilerParams(
                dimension_semantics=("parallel",),
                vmem_limit_bytes=limit,
            ),
        )(x2d)
        return out2d.reshape(orig_shape)

    # ------------- Path B: softmax over a non-trailing axis ------------------
    # Fold leading dims -> B and trailing dims -> T with a pure reshape (no HBM
    # transpose); reduce over the middle (sublane) axis in-kernel with a
    # lane-dense block on the true last axis.
    S = orig_shape[dim]
    B = math.prod(orig_shape[:dim]) if dim > 0 else 1
    T = math.prod(orig_shape[dim + 1:])
    if T < 128:
        # Lane-sparse last axis: XLA reduces a middle dim without transposing.
        return _softmax_xla(x, dim)
    if S * 128 * _bytes_per_elem(itemsize) > budget:
        # TODO(synk): chunk the S (reduction) axis with online max/sum
        # accumulation when S is too large for full block residency.
        return _softmax_xla(x, dim)

    x3d = x.reshape(B, S, T)                         # pure reshape, no transpose
    TL = _pick_lane_tile(B, S, T, itemsize, vmem_bytes)
    limit = _vmem_limit(S * TL, itemsize, vmem_bytes)

    out3d = pl.pallas_call(
        _softmax_middim_kernel,
        out_shape=jax.ShapeDtypeStruct((B, S, T), x.dtype),
        grid=(B, pl.cdiv(T, TL)),
        in_specs=[pl.BlockSpec((1, S, TL), lambda b, j: (b, 0, j))],
        out_specs=pl.BlockSpec((1, S, TL), lambda b, j: (b, 0, j)),
        compiler_params=pltpu.CompilerParams(
            dimension_semantics=("parallel", "parallel"),
            vmem_limit_bytes=limit,
        ),
    )(x3d)
    return out3d.reshape(orig_shape)


# ---------------------------------------------------------------------------
# Self-test
# ---------------------------------------------------------------------------

if __name__ == "__main__":
    key = jax.random.PRNGKey(0)
    k1, k2, k3, k4 = jax.random.split(key, 4)

    def reference(x, d):
        # Exact semantics of the PyTorch module (no overflow at these scales).
        num = jnp.exp(x)
        return num / jnp.sum(num, axis=d, keepdims=True)

    # 1) Attention-score-like input, lane-dense trailing softmax axis -> path A.
    x1 = jax.random.normal(k1, (2, 4, 128, 128), dtype=jnp.float32)
    o1 = jax.block_until_ready(pallas_softmax(x1, dim=-1))
    assert o1.shape == x1.shape and o1.dtype == x1.dtype
    assert jnp.allclose(o1, reference(x1, -1), atol=1e-5, rtol=1e-4), "mismatch (path A)"

    # 2) Non-trailing softmax axis with lane-dense trailing product -> path B
    #    (no moveaxis / HBM transpose round-trip).
    x2 = jax.random.normal(k2, (2, 64, 4, 32), dtype=jnp.float32)
    o2 = jax.block_until_ready(pallas_softmax(x2, dim=1))
    assert o2.shape == x2.shape and o2.dtype == x2.dtype
    assert jnp.allclose(o2, reference(x2, 1), atol=1e-5, rtol=1e-4), "mismatch (path B)"

    # 3) Lane-sparse trailing softmax axis (L < 128) -> XLA fallback path.
    x3 = jax.random.normal(k3, (2, 4, 8, 8), dtype=jnp.float32)
    o3 = jax.block_until_ready(pallas_softmax(x3, dim=-1))
    assert o3.shape == x3.shape and o3.dtype == x3.dtype
    assert jnp.allclose(o3, reference(x3, -1), atol=1e-6, rtol=1e-6), "mismatch (small L)"

    # 4) bf16 trailing softmax axis -> path A with 16-row sublane packing.
    x4 = jax.random.normal(k4, (2, 4, 64, 256), dtype=jnp.bfloat16)
    o4 = jax.block_until_ready(pallas_softmax(x4, dim=-1))
    assert o4.shape == x4.shape and o4.dtype == jnp.bfloat16
    ref4 = reference(x4.astype(jnp.float32), -1)
    assert jnp.allclose(o4.astype(jnp.float32), ref4, atol=1e-3, rtol=2e-2), "mismatch (bf16)"

    print("KERNEL_OK")
</pallas_src>

<mosaic_0001>
module attributes {stable_mosaic.version = 11 : i64} {
  func.func @_softmax_lastdim_kernel(%arg0: i32, %arg1: memref<128x128xf32, #tpu.memory_space<vmem>>, %arg2: memref<128x128xf32, #tpu.memory_space<vmem>>) attributes {dimension_semantics = [#tpu.dimension_semantics<parallel>], iteration_bounds = array<i64: 8>, scalar_prefetch = 0 : i64, scratch_operands = 0 : i64, tpu.core_type = #tpu.core_type<tc>, window_params = [{transform_indices = @transform_0, window_bounds = array<i64: 128, 128>}, {transform_indices = @transform_1, window_bounds = array<i64: 128, 128>}]} {
    %c0 = arith.constant 0 : index
    %c0_0 = arith.constant 0 : index
    %0 = vector.load %arg1[%c0, %c0_0] : memref<128x128xf32, #tpu.memory_space<vmem>>, vector<128x128xf32>
    %cst = arith.constant dense<0xFF800000> : vector<128xf32>
    %1 = vector.multi_reduction <maximumf>, %0, %cst [1] : vector<128x128xf32> to vector<128xf32>
    %2 = vector.shape_cast %1 : vector<128xf32> to vector<128x1xf32>
    %3 = vector.broadcast %2 : vector<128x1xf32> to vector<128x128xf32>
    %4 = arith.subf %0, %3 : vector<128x128xf32>
    %5 = math.exp %4 : vector<128x128xf32>
    %cst_1 = arith.constant dense<0.000000e+00> : vector<128xf32>
    %6 = vector.multi_reduction <add>, %5, %cst_1 [1] : vector<128x128xf32> to vector<128xf32>
    %7 = vector.shape_cast %6 : vector<128xf32> to vector<128x1xf32>
    %8 = tpu.reciprocal %7 {approx = true} : vector<128x1xf32> -> vector<128x1xf32>
    %9 = arith.mulf %7, %8 : vector<128x1xf32>
    %cst_2 = arith.constant 2.000000e+00 : f32
    %10 = vector.broadcast %cst_2 : f32 to vector<128x1xf32>
    %11 = arith.subf %10, %9 : vector<128x1xf32>
    %12 = arith.mulf %8, %11 : vector<128x1xf32>
    %13 = vector.broadcast %12 : vector<128x1xf32> to vector<128x128xf32>
    %14 = arith.mulf %5, %13 : vector<128x128xf32>
    %c0_3 = arith.constant 0 : index
    %c0_4 = arith.constant 0 : index
    %15 = vector.load %arg2[%c0_3, %c0_4] : memref<128x128xf32, #tpu.memory_space<vmem>>, vector<128x128xf32>
    tpu.vector_store %arg2[%c0_3, %c0_4], %14 {strides = array<i32>} : memref<128x128xf32, #tpu.memory_space<vmem>>, vector<128x128xf32>,
    return
  }
  func.func @transform_0(%arg0: i32) -> (i32, i32) {
    %c0_i32 = arith.constant 0 : i32
    %c0_i32_0 = arith.constant 0 : i32
    return %arg0, %c0_i32 : i32, i32
  }
  func.func @transform_1(%arg0: i32) -> (i32, i32) {
    %c0_i32 = arith.constant 0 : i32
    %c0_i32_0 = arith.constant 0 : i32
    return %arg0, %c0_i32 : i32, i32
  }
}

</mosaic_0001>

<bundles_post_ra>
// kernel: pallas_softmax.1
= control target key start
LH: loop header
LB: loop body
LE: loop exit
PB: predicated region body
PF: predicated region fallthrough
CT: control target
= control target key end

     0   :  { %6 = vsyncpa [#allocation3], 0  ;;  %s981_s0 = inlined_call_operand.hbm [shape: f32[1024,128], index: 0, kind: input, shape index: {}]   ;;  %s982_s1 = inlined_call_operand.hbm [shape: f32[1024,128], index: 1, kind: output, shape index: {}]  }
   0x1   :  { %8 = vsyncpa [#allocation3 + $0x1], 0 }
   0x2   :  { %9 = vsyncpa [#allocation4], 0 }
   0x3   :  { %11 = vsyncpa [#allocation4 + $0x1], 0  ;;  %s692_s6 = smov 0   ;;  %s694_s7 = smov 0  }
   0x4   :  { %s696_s8 = smov 0   ;;  %s698_s9 = smov 0  }
   0x5 LB: > { %s713_s10 = sadd.s32 4294967295, %s674_s9   ;;  %s448_s11 = sadd.s32 4294967294, %s674_s9   ;;  %s674_s9 = sphi %s698_s9, %s994_s9   ;;  %s670_s8 = sphi %s696_s8, %s993_s8   ;;  %s666_s7 = sphi %s694_s7, %s992_s7   ;;  %s662_s6 = sphi %s692_s6, %s991_s6  }
   0x6   : > { %s717_s12 = sadd.s32 1, %s674_s9   ;;  %s24_s13 = sadd.s32 1, %s670_s8 }
   0x7   : > { %s21_s14 = ssub.s32 %s674_s9, %s717_s12  ;;  %p31_p0 = scmp.ne.s32.totalorder %s670_s8, %s666_s7 }
   0x8   : > { %p22_p1 = scmp.eq.s32.totalorder %s21_s14, 0  ;;  %p32_p2 = scmp.eq.s32.totalorder %s674_s9, 0 }
   0x9   : > { %p37_p3 = scmp.ne.s32.totalorder %s666_s7, %s662_s6  ;;  %p38_p4 = scmp.eq.s32.totalorder %s713_s10, 0 }
   0xa   : > { %s729_s15 = scalar_select %p22_p1, %s670_s8, %s24_s13  }
   0xb   : > { %p731_p5 = por %p32_p2, %p31_p0  ;;  %p735_p6 = por %p38_p4, %p37_p3 }
   0xc   : > { %p61_p7 = scmp.eq.s32.totalorder %s713_s10, 7  ;;  %p67_p8 = scmp.eq.s32.totalorder %s448_s11, 7 }
   0xd   : > { %p476_p9 = scmp.lt.s32.totalorder %s674_s9, 8  ;;  %s87_s20 = sand.u32 1, %s670_s8  }
   0xe   : > { %p741_p10 = por %p61_p7, %p31_p0  ;;  %p745_p11 = por %p67_p8, %p37_p3 }
   0xf   : > { %s462_s21 = sshll.u32 %s674_s9, 11  ;;  %s451_s22 = sshll.u32 %s87_s20, 7 }
  0x10   : > { %s986_s18 = scalar_select %p741_p10, 1, 0 }
  0x11   : > { %s987_s19 = scalar_select %p745_p11, 1, 0 }
  0x12   : > { %s754_s25 = scalar_lea.hbm %s981_s0, %s462_s21  ;;  %s91_s26 = scalar_lea.vmem [#allocation2], %s451_s22 }
  0x13   : > { %s98_s27 = sshll.u32 %s91_s26, 4  ;;  %p758_p12 = pnand %p476_p9, %p731_p5  ;;  %s762_s27 = int_to_ptr.vmem [resolvable:$true] %s98_s27 }
  0x14   : > { %s764_s29 = scalar_lea.sflag [#allocation3], %s87_s20  ;;  %s578_s30 = scalar_lea.hbm %s754_s25, 2048 }
  0x15   : > { %p579_p13 = scmp.ne.s32.totalorder %s754_s25, %s578_s30  ;;  %p580_p0 = pneg %p758_p12 }
  0x16   : > { %s583_s4 = scalar_lea.hbm %s981_s0, 16384  ;;  %p584_p3 = scmp.lt.u32.totalorder %s754_s25, %s981_s0 }
  0x17   : > { %p581_p1 = pnand %p580_p0, %p579_p13  ;;  %p585_p4 = scmp.lt.u32.totalorder %s583_s4, %s578_s30 }
  0x18   : > { %p587_p7 = scmp.lt.u32.totalorder %s578_s30, %s754_s25 }
  0x19   : > { %p582_p2 = pneg %p581_p1  ;;  %p586_p5 = por %p585_p4, %p584_p3 }
  0x1b   : > { %p588_p8 = por %p587_p7, %p586_p5 }
  0x1d   : > { %p589_p9 = pnand %p588_p8, %p582_p2 }
  0x1f   : > { %592 = shalt.err (!%p589_p9)
}
  0x20   : > { %s593_s13 = scalar_lea.vmem %s762_s27, 2048  ;;  %s676_s14 = smov [#allocation2]  }
  0x21   : > { %p594_p13 = scmp.ne.s32.totalorder %s762_s27, %s593_s13  ;;  %s598_s16 = sshll.u32 %s676_s14, 4  ;;  %s599_s16 = int_to_ptr.vmem [resolvable:$false] %s598_s16 }
  0x22   : > { %s600_s20 = scalar_lea.vmem %s599_s16, 4096  ;;  %p601_p10 = scmp.lt.s32.totalorder %s762_s27, %s599_s16 }
  0x23   : > { %p596_p1 = pnand %p594_p13, %p580_p0  ;;  %p602_p3 = scmp.lt.s32.totalorder %s600_s20, %s593_s13 }
  0x25   : > { %p597_p11 = pneg %p596_p1  ;;  %p603_p4 = por %p602_p3, %p601_p10 }
  0x27   : > { %p604_p5 = pnand %p603_p4, %p597_p11 }
  0x29   : > { %607 = shalt.err (!%p604_p5)
}
  0x2a   : > { %s677_s21 = smov 128   ;;  %s678_s22 = smov 8  }
  0x2b   : > { %471 = dma.hbm_to_vmem [thread:$0]  (!%p758_p12), %s754_s25, 2048, %s762_s27, %s764_s29, %s677_s21, %s677_s21, %s678_s22  }
  0x2c   : > { %p454_p0 = scmp.ge.s32.totalorder %s674_s9, 1  ;;  %p106_p2 = scmp.lt.s32.totalorder %s674_s9, 9 }
  0x2e   : > { %p107_p7 = pnand %p454_p0, %p106_p2 }
  0x2f   : > { %s795_s23 = sand.u32 (!%p107_p7), 1, %s666_s7  }
  0x30   : > { %110 = sbr.rel (%p107_p7) target bundleno = 422 (0x1a6), region = 24  ;;  %s455_s24 = sshll.u32 (!%p107_p7), %s795_s23, 7 }
  0x31   : > { %s113_s26 = scalar_lea.sflag (!%p107_p7), [#allocation3], %s795_s23  ;;  %s801_s30 = scalar_lea.vmem (!%p107_p7), [#allocation2], %s455_s24 }
  0x37   : > { %653 = dma.done.wait (%p735_p6), %s113_s26, 2048  }
  0x38   : > { %655 = vsyncadd (%p735_p6), %s113_s26, 4294965248  ;;  %v137_v0 = vld [vmem:[%s801_s30] sm:$0xff]  ;;  %v139_v1 = vld [vmem:[%s801_s30 + $0x10] sm:$0xff]  ;;  %s898_s17 = scalar_lea.vmem [#allocation5], %s455_s24  ;;  %s463_s25 = sshll.u32 %s713_s10, 11 }
  0x39   : > { %153 = vmax.xlane.f32.xlu0 %v137_v0  ;;  %157 = vmax.xlane.f32.xlu1 %v139_v1  ;;  %v138_v2 = vld [vmem:[%s801_s30 + $0x8] sm:$0xff]  ;;  %v140_v3 = vld [vmem:[%s801_s30 + $0x18] sm:$0xff]  ;;  %v141_v4 = vld [vmem:[%s801_s30 + $0x20] sm:$0xff]  ;;  %s375_s27 = sshll.u32 %s898_s17, 4  ;;  %s934_s2 = scalar_lea.hbm %s982_s1, %s463_s25  ;;  %s936_s27 = int_to_ptr.vmem [resolvable:$true] %s375_s27 }
  0x3a   : > { %v142_v5 = vld [vmem:[%s801_s30 + $0x28] sm:$0xff]  ;;  %v143_v6 = vld [vmem:[%s801_s30 + $0x30] sm:$0xff]  ;;  %v144_v7 = vld [vmem:[%s801_s30 + $0x38] sm:$0xff]  ;;  %s362_s10 = scalar_lea.sflag [#allocation4], %s795_s23  ;;  %s608_s3 = scalar_lea.vmem %s936_s27, 2048 }
  0x3b   : > { %v145_v8 = vld [vmem:[%s801_s30 + $0x40] sm:$0xff]  ;;  %v146_v9 = vld [vmem:[%s801_s30 + $0x48] sm:$0xff]  ;;  %v818_v10 = vld [vmem:[%s801_s30 + $0x50] sm:$0xff]  ;;  %p609_p6 = scmp.ne.s32.totalorder %s936_s27, %s608_s3  ;;  %p989_p10 = scmp.ne.s32.totalorder %s986_s18, 0 }
  0x3c   : > { %v821_v11 = vld [vmem:[%s801_s30 + $0x58] sm:$0xff]  ;;  %v826_v12 = vld [vmem:[%s801_s30 + $0x60] sm:$0xff]  ;;  %v829_v13 = vld [vmem:[%s801_s30 + $0x68] sm:$0xff]  ;;  %s679_s4 = smov [#allocation5]  }
  0x3d   : > { %155 = vmax.xlane.f32.xlu0 %v138_v2  ;;  %159 = vmax.xlane.f32.xlu1 %v140_v3  ;;  %v834_v14 = vld [vmem:[%s801_s30 + $0x70] sm:$0xff]  ;;  %v837_v15 = vld [vmem:[%s801_s30 + $0x78] sm:$0xff]  ;;  %p610_p11 = pnand %p609_p6, %p989_p10  ;;  %s612_s5 = sshll.u32 %s679_s4, 4  ;;  %s613_s5 = int_to_ptr.vmem [resolvable:$false] %s612_s5 }
  0x3e   : > { %s614_s11 = scalar_lea.vmem %s613_s5, 4096  ;;  %p615_p8 = scmp.lt.s32.totalorder %s936_s27, %s613_s5 }
  0x3f   : > { %p611_p12 = pneg %p610_p11  ;;  %p616_p9 = scmp.lt.s32.totalorder %s614_s11, %s608_s3 }
  0x41   : > { %161 = vmax.xlane.f32.xlu0 %v141_v4  ;;  %163 = vmax.xlane.f32.xlu1 %v142_v5  ;;  %p617_p13 = por %p616_p9, %p615_p8 }
  0x43   : > { %p618_p1 = pnand %p617_p13, %p611_p12 }
  0x45   : > { %165 = vmax.xlane.f32.xlu0 %v143_v6  ;;  %167 = vmax.xlane.f32.xlu1 %v144_v7 }
  0x49   : > { %169 = vmax.xlane.f32.xlu0 %v145_v8  ;;  %171 = vmax.xlane.f32.xlu1 %v146_v9 }
  0x4d   : > { %173 = vmax.xlane.f32.xlu0 %v818_v10  ;;  %175 = vmax.xlane.f32.xlu1 %v821_v11 }
  0x51   : > { %177 = vmax.xlane.f32.xlu0 %v826_v12  ;;  %179 = vmax.xlane.f32.xlu1 %v829_v13 }
  0x55   : > { %181 = vmax.xlane.f32.xlu0 %v834_v14  ;;  %183 = vmax.xlane.f32.xlu1 %v837_v15 }
  0xc6   : > { %v154_v16 = vpop.xlane.xlu0 %153  ;;  %v158_v17 = vpop.xlane.xlu1 %157 }
  0xc7   : > { %v185_v18 = vsub.f32 %v137_v0, %v154_v16  ;;  %v187_v19 = vsub.f32 %v139_v1, %v158_v17 }
  0xc9   : > { %v201_v20 = vmul.f32 1.442695, %v185_v18  ;;  %v205_v21 = vmul.f32 1.442695, %v187_v19 }
  0xca   : > { %v156_v22 = vpop.xlane.xlu0 %155  ;;  %v160_v23 = vpop.xlane.xlu1 %159 }
  0xcb   : > { %514 = vpow2.f32 %v201_v20  ;;  %v186_v24 = vsub.f32 %v138_v2, %v156_v22  ;;  %v188_v25 = vsub.f32 %v140_v3, %v160_v23 }
  0xcc   : > { %516 = vpow2.f32 %v205_v21 }
  0xcd   : > { %v203_v26 = vmul.f32 1.442695, %v186_v24  ;;  %v207_v27 = vmul.f32 1.442695, %v188_v25 }
  0xce   : > { %v162_v28 = vpop.xlane.xlu0 %161  ;;  %v164_v29 = vpop.xlane.xlu1 %163 }
  0xcf   : > { %518 = vpow2.f32 %v203_v26  ;;  %v189_v30 = vsub.f32 %v141_v4, %v162_v28  ;;  %v190_v31 = vsub.f32 %v142_v5, %v164_v29 }
  0xd0   : > { %520 = vpow2.f32 %v207_v27 }
  0xd1   : > { %v209_v32 = vmul.f32 1.442695, %v189_v30  ;;  %v211_v33 = vmul.f32 1.442695, %v190_v31 }
  0xd2   : > { %v166_v34 = vpop.xlane.xlu0 %165  ;;  %v168_v35 = vpop.xlane.xlu1 %167 }
  0xd3   : > { %522 = vpow2.f32 %v209_v32  ;;  %v191_v36 = vsub.f32 %v143_v6, %v166_v34  ;;  %v192_v37 = vsub.f32 %v144_v7, %v168_v35 }
  0xd4   : > { %524 = vpow2.f32 %v211_v33 }
  0xd5   : > { %v841_v38 = vpop.eup %514  ;;  %v213_v39 = vmul.f32 1.442695, %v191_v36  ;;  %v215_v40 = vmul.f32 1.442695, %v192_v37 }
  0xd6   : > { %233 = vadd.xlane.f32.xlu0 %v841_v38  ;;  %v170_v41 = vpop.xlane.xlu0 %169  ;;  %v172_v42 = vpop.xlane.xlu1 %171 }
  0xd7   : > { %v844_v43 = vpop.eup %516  ;;  %526 = vpow2.f32 %v213_v39  ;;  %v193_v44 = vsub.f32 %v145_v8, %v170_v41  ;;  %v194_v45 = vsub.f32 %v146_v9, %v172_v42 }
  0xd8   : > { %528 = vpow2.f32 %v215_v40 }
  0xd9   : > { %v846_v46 = vpop.eup %518  ;;  %v217_v47 = vmul.f32 1.442695, %v193_v44  ;;  %v219_v48 = vmul.f32 1.442695, %v194_v45 }
  0xda   : > { %237 = vadd.xlane.f32.xlu0 %v844_v43  ;;  %235 = vadd.xlane.f32.xlu1 %v846_v46  ;;  %v174_v49 = vpop.xlane.xlu0 %173  ;;  %v176_v50 = vpop.xlane.xlu1 %175 }
  0xdb   : > { %v850_v51 = vpop.eup %520  ;;  %530 = vpow2.f32 %v217_v47  ;;  %v195_v52 = vsub.f32 %v818_v10, %v174_v49  ;;  %v196_v53 = vsub.f32 %v821_v11, %v176_v50 }
  0xdc   : > { %532 = vpow2.f32 %v219_v48 }
  0xdd   : > { %v854_v54 = vpop.eup %522  ;;  %v221_v55 = vmul.f32 1.442695, %v195_v52  ;;  %v223_v56 = vmul.f32 1.442695, %v196_v53 }
  0xde   : > { %239 = vadd.xlane.f32.xlu1 %v850_v51  ;;  %241 = vadd.xlane.f32.xlu0 %v854_v54  ;;  %v178_v57 = vpop.xlane.xlu0 %177  ;;  %v180_v58 = vpop.xlane.xlu1 %179 }
  0xdf   : > { %v858_v59 = vpop.eup %524  ;;  %534 = vpow2.f32 %v221_v55  ;;  %v197_v60 = vsub.f32 %v826_v12, %v178_v57  ;;  %v198_v61 = vsub.f32 %v829_v13, %v180_v58 }
  0xe0   : > { %536 = vpow2.f32 %v223_v56 }
  0xe1   : > { %v862_v62 = vpop.eup %526  ;;  %v225_v63 = vmul.f32 1.442695, %v197_v60  ;;  %v227_v0 = vmul.f32 1.442695, %v198_v61 }
  0xe2   : > { %243 = vadd.xlane.f32.xlu1 %v858_v59  ;;  %245 = vadd.xlane.f32.xlu0 %v862_v62  ;;  %v182_v1 = vpop.xlane.xlu0 %181  ;;  %v184_v2 = vpop.xlane.xlu1 %183 }
  0xe3   : > { %v866_v3 = vpop.eup %528  ;;  %538 = vpow2.f32 %v225_v63  ;;  %v199_v4 = vsub.f32 %v834_v14, %v182_v1  ;;  %v200_v5 = vsub.f32 %v837_v15, %v184_v2 }
  0xe4   : > { %540 = vpow2.f32 %v227_v0 }
  0xe5   : > { %v870_v6 = vpop.eup %530  ;;  %v229_v7 = vmul.f32 1.442695, %v199_v4  ;;  %v231_v8 = vmul.f32 1.442695, %v200_v5 }
  0xe6   : > { %247 = vadd.xlane.f32.xlu1 %v866_v3  ;;  %249 = vadd.xlane.f32.xlu0 %v870_v6  ;;  %v874_v9 = vpop.eup %532 }
  0xe7   : > { %542 = vpow2.f32 %v229_v7 }
  0xe8   : > { %544 = vpow2.f32 %v231_v8 }
  0xe9   : > { %v876_v10 = vpop.eup %534 }
  0xea   : > { %251 = vadd.xlane.f32.xlu1 %v874_v9  ;;  %253 = vadd.xlane.f32.xlu0 %v876_v10  ;;  %v880_v11 = vpop.eup %536 }
  0xed   : > { %v882_v12 = vpop.eup %538 }
  0xee   : > { %255 = vadd.xlane.f32.xlu1 %v880_v11  ;;  %257 = vadd.xlane.f32.xlu0 %v882_v12  ;;  %v886_v13 = vpop.eup %540 }
  0xf1   : > { %v888_v14 = vpop.eup %542 }
  0xf2   : > { %259 = vadd.xlane.f32.xlu1 %v886_v13  ;;  %261 = vadd.xlane.f32.xlu0 %v888_v14  ;;  %v892_v15 = vpop.eup %544 }
  0xf6   : > { %263 = vadd.xlane.f32.xlu1 %v892_v15 }
 0x163   : > { %v234_v16 = vpop.xlane.xlu0 %233 }
 0x164   : > { %546 = vrcp.f32 %v234_v16 }
 0x167   : > { %v236_v17 = vpop.xlane.xlu1 %235  ;;  %v238_v18 = vpop.xlane.xlu0 %237 }
 0x168   : > { %548 = vrcp.f32 %v236_v17 }
 0x169   : > { %550 = vrcp.f32 %v238_v18 }
 0x16b   : > { %v240_v19 = vpop.xlane.xlu1 %239  ;;  %v242_v20 = vpop.xlane.xlu0 %241 }
 0x16c   : > { %552 = vrcp.f32 %v240_v19 }
 0x16d   : > { %554 = vrcp.f32 %v242_v20 }
 0x16e   : > { %v547_v21 = vpop.eup %546 }
 0x16f   : > { %v281_v22 = vmul.f32 %v547_v21, %v234_v16  ;;  %v244_v23 = vpop.xlane.xlu1 %243  ;;  %v246_v24 = vpop.xlane.xlu0 %245 }
 0x170   : > { %556 = vrcp.f32 %v244_v23 }
 0x171   : > { %v297_v25 = vsub.f32 2.0, %v281_v22  ;;  %558 = vrcp.f32 %v246_v24 }
 0x172   : > { %v549_v26 = vpop.eup %548 }
 0x173   : > { %v551_v27 = vpop.eup %550  ;;  %v313_v28 = vmul.f32 %v547_v21, %v297_v25  ;;  %v282_v29 = vmul.f32 %v549_v26, %v236_v17  ;;  %v248_v30 = vpop.xlane.xlu1 %247 }
 0x174   : > { %v250_v31 = vpop.xlane.xlu0 %249  ;;  %v283_v32 = vmul.f32 %v551_v27, %v238_v18  ;;  %560 = vrcp.f32 %v248_v30 }
 0x175   : > { %v329_v33 = vmul.f32 %v841_v38, %v313_v28  ;;  %v298_v34 = vsub.f32 2.0, %v282_v29  ;;  %562 = vrcp.f32 %v250_v31 }
 0x176   : > { %v553_v35 = vpop.eup %552  ;;  %v299_v36 = vsub.f32 2.0, %v283_v32 }
 0x177   : > { %v555_v37 = vpop.eup %554  ;;  %345 = vst [vmem:[%s898_s17] sm:$0xff] %v329_v33  ;;  %v314_v39 = vmul.f32 %v549_v26, %v298_v34  ;;  %v284_v40 = vmul.f32 %v553_v35, %v240_v19  ;;  %v252_v41 = vpop.xlane.xlu1 %251 }
 0x178   : > { %v254_v42 = vpop.xlane.xlu0 %253  ;;  %v315_v44 = vmul.f32 %v551_v27, %v299_v36  ;;  %v285_v45 = vmul.f32 %v555_v37, %v242_v20  ;;  %564 = vrcp.f32 %v252_v41 }
 0x179   : > { %v330_v38 = vmul.f32 %v846_v46, %v314_v39  ;;  %v300_v47 = vsub.f32 2.0, %v284_v40  ;;  %566 = vrcp.f32 %v254_v42 }
 0x17a   : > { %v557_v48 = vpop.eup %556  ;;  %v331_v49 = vmul.f32 %v844_v43, %v315_v44  ;;  %v301_v50 = vsub.f32 2.0, %v285_v45 }
 0x17b   : > { %v559_v52 = vpop.eup %558  ;;  %346 = vst [vmem:[%s898_s17 + $0x8] sm:$0xff] %v330_v38  ;;  %v316_v53 = vmul.f32 %v553_v35, %v300_v47  ;;  %v286_v55 = vmul.f32 %v557_v48, %v244_v23  ;;  %v256_v56 = vpop.xlane.xlu1 %255 }
 0x17c   : > { %v258_v57 = vpop.xlane.xlu0 %257  ;;  %347 = vst [vmem:[%s898_s17 + $0x10] sm:$0xff] %v331_v49  ;;  %v317_v58 = vmul.f32 %v555_v37, %v301_v50  ;;  %v287_v60 = vmul.f32 %v559_v52, %v246_v24  ;;  %568 = vrcp.f32 %v256_v56 }
 0x17d   : > { %v332_v46 = vmul.f32 %v850_v51, %v316_v53  ;;  %v302_v61 = vsub.f32 2.0, %v286_v55  ;;  %570 = vrcp.f32 %v258_v57 }
 0x17e   : > { %v561_v63 = vpop.eup %560  ;;  %v333_v43 = vmul.f32 %v854_v54, %v317_v58  ;;  %v303_v0 = vsub.f32 2.0, %v287_v60 }
 0x17f   : > { %v563_v1 = vpop.eup %562  ;;  %348 = vst [vmem:[%s898_s17 + $0x18] sm:$0xff] %v332_v46  ;;  %v318_v2 = vmul.f32 %v557_v48, %v302_v61  ;;  %v288_v4 = vmul.f32 %v561_v63, %v248_v30  ;;  %v260_v5 = vpop.xlane.xlu1 %259 }
 0x180   : > { %v262_v7 = vpop.xlane.xlu0 %261  ;;  %349 = vst [vmem:[%s898_s17 + $0x20] sm:$0xff] %v333_v43  ;;  %v319_v8 = vmul.f32 %v559_v52, %v303_v0  ;;  %v289_v16 = vmul.f32 %v563_v1, %v250_v31  ;;  %572 = vrcp.f32 %v260_v5 }
 0x181   : > { %v334_v51 = vmul.f32 %v858_v59, %v318_v2  ;;  %v304_v17 = vsub.f32 2.0, %v288_v4  ;;  %574 = vrcp.f32 %v262_v7 }
 0x182   : > { %v565_v18 = vpop.eup %564  ;;  %v335_v54 = vmul.f32 %v862_v62, %v319_v8  ;;  %v305_v19 = vsub.f32 2.0, %v289_v16 }
 0x183   : > { %v567_v20 = vpop.eup %566  ;;  %350 = vst [vmem:[%s898_s17 + $0x28] sm:$0xff] %v334_v51  ;;  %v320_v21 = vmul.f32 %v561_v63, %v304_v17  ;;  %v290_v22 = vmul.f32 %v565_v18, %v252_v41  ;;  %v264_v23 = vpop.xlane.xlu1 %263 }
 0x184   : > { %351 = vst [vmem:[%s898_s17 + $0x30] sm:$0xff] %v335_v54  ;;  %v321_v24 = vmul.f32 %v563_v1, %v305_v19  ;;  %v291_v25 = vmul.f32 %v567_v20, %v254_v42  ;;  %576 = vrcp.f32 %v264_v23 }
 0x185   : > { %v336_v26 = vmul.f32 %v866_v3, %v320_v21  ;;  %v306_v59 = vsub.f32 2.0, %v290_v22 }
 0x186   : > { %v569_v27 = vpop.eup %568  ;;  %v337_v28 = vmul.f32 %v870_v6, %v321_v24  ;;  %v307_v62 = vsub.f32 2.0, %v291_v25 }
 0x187   : > { %v571_v29 = vpop.eup %570  ;;  %352 = vst [vmem:[%s898_s17 + $0x38] sm:$0xff] %v336_v26  ;;  %v322_v30 = vmul.f32 %v565_v18, %v306_v59  ;;  %v292_v31 = vmul.f32 %v569_v27, %v256_v56 }
 0x188   : > { %353 = vst [vmem:[%s898_s17 + $0x40] sm:$0xff] %v337_v28  ;;  %v323_v32 = vmul.f32 %v567_v20, %v307_v62  ;;  %v293_v33 = vmul.f32 %v571_v29, %v258_v57 }
 0x189   : > { %v338_v34 = vmul.f32 %v874_v9, %v322_v30  ;;  %v308_v35 = vsub.f32 2.0, %v292_v31 }
 0x18a   : > { %v573_v36 = vpop.eup %572  ;;  %v339_v3 = vmul.f32 %v876_v10, %v323_v32  ;;  %v309_v37 = vsub.f32 2.0, %v293_v33 }
 0x18b   : > { %v575_v39 = vpop.eup %574  ;;  %354 = vst [vmem:[%s898_s17 + $0x48] sm:$0xff] %v338_v34  ;;  %v324_v6 = vmul.f32 %v569_v27, %v308_v35  ;;  %v294_v40 = vmul.f32 %v573_v36, %v260_v5 }
 0x18c   : > { %355 = vst [vmem:[%s898_s17 + $0x50] sm:$0xff] %v339_v3  ;;  %v325_v41 = vmul.f32 %v571_v29, %v309_v37  ;;  %v295_v42 = vmul.f32 %v575_v39, %v262_v7 }
 0x18d   : > { %v340_v44 = vmul.f32 %v880_v11, %v324_v6  ;;  %v310_v9 = vsub.f32 2.0, %v294_v40 }
 0x18e   : > { %v577_v45 = vpop.eup %576  ;;  %v341_v38 = vmul.f32 %v882_v12, %v325_v41  ;;  %v311_v10 = vsub.f32 2.0, %v295_v42 }
 0x18f   : > { %356 = vst [vmem:[%s898_s17 + $0x58] sm:$0xff] %v340_v44  ;;  %v326_v47 = vmul.f32 %v573_v36, %v310_v9  ;;  %v296_v48 = vmul.f32 %v577_v45, %v264_v23 }
 0x190   : > { %357 = vst [vmem:[%s898_s17 + $0x60] sm:$0xff] %v341_v38  ;;  %v327_v49 = vmul.f32 %v575_v39, %v311_v10 }
 0x191   : > { %v342_v50 = vmul.f32 %v886_v13, %v326_v47  ;;  %v312_v52 = vsub.f32 2.0, %v296_v48 }
 0x192   : > { %v343_v11 = vmul.f32 %v888_v14, %v327_v49 }
 0x193   : > { %358 = vst [vmem:[%s898_s17 + $0x68] sm:$0xff] %v342_v50  ;;  %v328_v53 = vmul.f32 %v577_v45, %v312_v52 }
 0x194   : > { %359 = vst [vmem:[%s898_s17 + $0x70] sm:$0xff] %v343_v11 }
 0x195   : > { %v344_v12 = vmul.f32 %v892_v15, %v328_v53 }
 0x197   : > { %360 = vst [vmem:[%s898_s17 + $0x78] sm:$0xff] %v344_v12 }
 0x198   : > { %621 = shalt.err (!%p618_p1)
}
 0x199   : > { %s622_s13 = scalar_lea.hbm %s934_s2, 2048  ;;  %s626_s20 = scalar_lea.hbm %s982_s1, 16384 }
 0x19a   : > { %p623_p3 = scmp.ne.s32.totalorder %s934_s2, %s622_s13  ;;  %p627_p0 = scmp.lt.u32.totalorder %s934_s2, %s982_s1 }
 0x19b   : > { %p628_p2 = scmp.lt.u32.totalorder %s626_s20, %s622_s13  ;;  %p630_p6 = scmp.lt.u32.totalorder %s622_s13, %s934_s2 }
 0x19c   : > { %p624_p4 = pnand %p623_p3, %p989_p10 }
 0x19d   : > { %p629_p7 = por %p628_p2, %p627_p0 }
 0x19e   : > { %p625_p5 = pneg %p624_p4 }
 0x19f   : > { %p631_p11 = por %p630_p6, %p629_p7 }
 0x1a1   : > { %p632_p12 = pnand %p631_p11, %p625_p5 }
 0x1a3   : > { %635 = shalt.err (!%p632_p12)
}
 0x1a4   : > { %s680_s24 = smov 128   ;;  %s681_s26 = smov 8  }
 0x1a5   : > { %466 = dma.vmem_to_hbm [thread:$0]  (%p989_p10), %s936_s27, 2048, %s934_s2, %s362_s10, %s680_s24, %s680_s24, %s681_s26  }
 0x1a6 PF: > { %p477_p8 = scmp.ge.s32.totalorder %s674_s9, 2  ;;  %s390_s30 = sand.u32 1, %s662_s6  }
 0x1a7   : > { %p990_p9 = scmp.ne.s32.totalorder %s987_s19, 0  ;;  %s391_s17 = scalar_lea.sflag [#allocation4], %s390_s30 }
 0x1a9   : > { %p473_p13 = pnand %p477_p8, %p990_p9 }
 0x1ab   : > { %657 = dma.done.wait (!%p473_p13), %s391_s17, 2048  }
 0x1ac   : > { %659 = vsyncadd (!%p473_p13), %s391_s17, 4294965248  ;;  %p14_p1 = scmp.ge.s32.totalorder %s717_s12, 10   ;;  %s991_s6 = smov %s666_s7 }
 0x1ad   : > { %s992_s7 = smov %s670_s8  ;;  %s993_s8 = smov %s729_s15 }
 0x1ae   : > { %s994_s9 = smov %s717_s12  ;;  %16 = sbr.rel (!%p14_p1) target bundleno = 5 (0x5), region = 69 }
 0x1b5   :  { %396 = vsyncpa [#allocation3], 1 }
 0x1b6   :  { %398 = vsyncpa [#allocation3 + $0x1], 1 }
 0x1b7   :  { %399 = vsyncpa [#allocation4], 1 }
 0x1b8   :  { %401 = vsyncpa [#allocation4 + $0x1], 1 }

</bundles_post_ra>
